<compile_context>
chip_gen: v5e
topology: v5e:2x2
jax: 0.10.0
libtpu: 0.0.40
codegen_flags: <defaults>
</compile_context>

<pallas_src>
import functools

import jax
import jax.numpy as jnp
import numpy as np
from jax.experimental import pallas as pl
from jax.experimental.pallas import tpu as pltpu

NEG_SLOPE = 0.01  # nn.LeakyReLU() default


def _leaky(v):
    return jnp.where(v >= 0, v, NEG_SLOPE * v)


def res_kernel(x_ref, w0_ref, b0_ref, w1_ref, b1_ref, w2_ref, b2_ref,
               mw0_ref, mwl_ref, mh0_ref, mhl_ref, out_ref, *, W):
    # x_ref: (C, S) with S = images_per_group * H * W (group dim squeezed away).
    C, S = x_ref.shape
    C2 = w0_ref.shape[0]

    x = x_ref[...].astype(jnp.float32)                        # (C, S)

    # ---- conv0 (1x1) + LeakyReLU: (C2, C) @ (C, S) -> (C2, S) --------------
    x0 = _leaky(jnp.dot(w0_ref[...], x,
                        preferred_element_type=jnp.float32) + b0_ref[...])

    # ---- precomputed per-image boundary masks (1, S), broadcast over C2 ----
    w_first = mw0_ref[...] > 0.5          # w == 0
    w_last = mwl_ref[...] > 0.5           # w == W - 1
    h_first = mh0_ref[...] > 0.5          # h == 0        (per image)
    h_last = mhl_ref[...] > 0.5           # h == H - 1    (per image)

    def shift_w(a, dj):
        # a[:, img, h, clamp(w + dj, 0, W-1)] on the flattened spatial axis.
        if dj == 0:
            return a
        rolled = pltpu.roll(a, (-dj) % S, 1)
        edge = w_last if dj > 0 else w_first
        return jnp.where(edge, a, rolled)

    def shift_h(a, di):
        # a[:, img, clamp(h + di, 0, H-1), w] on the flattened spatial axis.
        if di == 0:
            return a
        rolled = pltpu.roll(a, (-di * W) % S, 1)
        edge = h_last if di > 0 else h_first
        return jnp.where(edge, a, rolled)

    cols = [shift_w(x0, dj) for dj in (-1, 0, 1)]             # 2 rolls, live: 3

    # ---- conv1 (3x3) as 3 accumulating im2col dots (K = 3*C2 each) ---------
    # w1_ref is (3, C2, 3*C2) with column index kw*C2 + cin for kh group kh_i.
    acc = None
    for kh_i in range(3):
        rows = jnp.concatenate([shift_h(cols[kw], kh_i - 1) for kw in range(3)],
                               axis=0)                        # (3*C2, S)
        d = jnp.dot(w1_ref[kh_i], rows, preferred_element_type=jnp.float32)
        acc = d if acc is None else acc + d
    x1 = _leaky(acc + b1_ref[...])

    # ---- conv2 (1x1) + LeakyReLU -------------------------------------------
    x2 = _leaky(jnp.dot(w2_ref[...], x1,
                        preferred_element_type=jnp.float32) + b2_ref[...])

    # ---- residual add, lane-dense (unmasked) store --------------------------
    out_ref[...] = (x2 + x).astype(out_ref.dtype)


def prepare_params(w0, b0, w1, b1, w2, b2):
    """One-time parameter prep (hoisted out of the per-call path).

    w0:(C2,C)  b0:(C2,)  w1:(C2,C2,3,3) OIHW  b1:(C2,)  w2:(C,C2)  b2:(C,)
    """
    C2 = w0.shape[0]
    C = w2.shape[0]
    # Per-kh im2col weight blocks: w1g[kh, o, kw*C2 + cin] = w1[o, cin, kh, kw]
    w1g = jnp.transpose(w1, (2, 0, 3, 1)).reshape(3, C2, 3 * C2)
    return {
        "w0": w0.astype(jnp.float32),
        "b0": b0.reshape(C2, 1).astype(jnp.float32),
        "w1g": w1g.astype(jnp.float32),
        "b1": b1.reshape(C2, 1).astype(jnp.float32),
        "w2": w2.astype(jnp.float32),
        "b2": b2.reshape(C, 1).astype(jnp.float32),
    }


def _pick_num_groups(n):
    """1 group (fold whole batch into lanes) on 1-TC chips; 2 on v7x (2 TCs)."""
    try:
        kind = jax.devices()[0].device_kind.lower()
    except Exception:  # pragma: no cover - defensive
        kind = ""
    if "v7" in kind and n >= 2 and n % 2 == 0:
        return 2
    return 1


@functools.partial(jax.jit, static_argnames=("H", "W", "num_groups"))
def _res_pallas(x_nchw, w0, b0c, w1g, b1c, w2, b2c, mw0, mwl, mh0, mhl,
                *, H, W, num_groups):
    N, C, _, _ = x_nchw.shape
    C2 = w0.shape[0]
    G = num_groups
    Ng = N // G
    Sg = Ng * H * W

    # Channels-first, batch folded into the lane axis: (G, C, Ng*H*W).
    x_flat = jnp.transpose(x_nchw.reshape(G, Ng, C, H * W),
                           (0, 2, 1, 3)).reshape(G, C, Sg)

    const2 = lambda g: (0, 0)

    out = pl.pallas_call(
        functools.partial(res_kernel, W=W),
        out_shape=jax.ShapeDtypeStruct((G, C, Sg), x_nchw.dtype),
        grid_spec=pltpu.PrefetchScalarGridSpec(
            num_scalar_prefetch=0,
            grid=(G,),
            in_specs=[
                pl.BlockSpec((pl.Squeezed(), C, Sg), lambda g: (g, 0, 0)),
                pl.BlockSpec((C2, C), const2),
                pl.BlockSpec((C2, 1), const2),
                pl.BlockSpec((3, C2, 3 * C2), lambda g: (0, 0, 0)),
                pl.BlockSpec((C2, 1), const2),
                pl.BlockSpec((C, C2), const2),
                pl.BlockSpec((C, 1), const2),
                pl.BlockSpec((1, Sg), const2),   # w == 0 mask
                pl.BlockSpec((1, Sg), const2),   # w == W-1 mask
                pl.BlockSpec((1, Sg), const2),   # h == 0 mask (per image)
                pl.BlockSpec((1, Sg), const2),   # h == H-1 mask (per image)
            ],
            out_specs=pl.BlockSpec((pl.Squeezed(), C, Sg), lambda g: (g, 0, 0)),
        ),
        compiler_params=pltpu.CompilerParams(
            dimension_semantics=("parallel",)),
    )(x_flat, w0, b0c, w1g, b1c, w2, b2c, mw0, mwl, mh0, mhl)

    return jnp.transpose(out.reshape(G, C, Ng, H * W),
                         (0, 2, 1, 3)).reshape(N, C, H, W)


def res_forward(x_nchw, params, *, num_groups=None):
    """x_nchw: (N,C,H,W), params: output of prepare_params. Returns (N,C,H,W)."""
    N, C, H, W = x_nchw.shape
    if num_groups is None:
        num_groups = _pick_num_groups(N)
    Ng = N // num_groups
    Sg = Ng * H * W

    # Precomputed replicate-padding boundary masks (host-side, shape-only).
    # A real caller would cache these alongside the params.
    pos = np.arange(Sg)
    w_idx = pos % W
    h_idx = (pos // W) % H
    masks = [
        jnp.asarray((w_idx == 0).astype(np.float32).reshape(1, Sg)),
        jnp.asarray((w_idx == W - 1).astype(np.float32).reshape(1, Sg)),
        jnp.asarray((h_idx == 0).astype(np.float32).reshape(1, Sg)),
        jnp.asarray((h_idx == H - 1).astype(np.float32).reshape(1, Sg)),
    ]
    return _res_pallas(x_nchw, params["w0"], params["b0"], params["w1g"],
                       params["b1"], params["w2"], params["b2"], *masks,
                       H=H, W=W, num_groups=num_groups)


def reference_forward(x, w0, b0, w1, b1, w2, b2):
    """Pure-JAX NCHW reference with identical semantics to the torch module."""
    dn = ("NCHW", "OIHW", "NCHW")

    def bias(b):
        return b[None, :, None, None]

    x0 = _leaky(jax.lax.conv_general_dilated(
        x, w0[:, :, None, None], (1, 1), "VALID", dimension_numbers=dn) + bias(b0))
    x0p = jnp.pad(x0, ((0, 0), (0, 0), (1, 1), (1, 1)), mode="edge")
    x1 = _leaky(jax.lax.conv_general_dilated(
        x0p, w1, (1, 1), "VALID", dimension_numbers=dn) + bias(b1))
    x2 = _leaky(jax.lax.conv_general_dilated(
        x1, w2[:, :, None, None], (1, 1), "VALID", dimension_numbers=dn) + bias(b2))
    return x2 + x


if __name__ == "__main__":
    # Small shapes consistent with Res(channel=4): x is NCHW (2, 4, 16, 16)
    N, C, H, W = 2, 4, 16, 16
    C2 = 2 * C

    key = jax.random.PRNGKey(0)
    kx, k0, kb0, k1, kb1, k2, kb2 = jax.random.split(key, 7)

    x = jax.random.normal(kx, (N, C, H, W), jnp.float32)
    # PyTorch-convention parameter shapes (1x1 conv weights squeezed to 2-D)
    w0 = jax.random.normal(k0, (C2, C), jnp.float32) * 0.1          # conv0: C -> 2C
    b0 = jax.random.normal(kb0, (C2,), jnp.float32) * 0.1
    w1 = jax.random.normal(k1, (C2, C2, 3, 3), jnp.float32) * 0.1   # conv1: OIHW 3x3
    b1 = jax.random.normal(kb1, (C2,), jnp.float32) * 0.1
    w2 = jax.random.normal(k2, (C, C2), jnp.float32) * 0.1          # conv2: 2C -> C
    b2 = jax.random.normal(kb2, (C,), jnp.float32) * 0.1

    params = prepare_params(w0, b0, w1, b1, w2, b2)
    out = jax.block_until_ready(res_forward(x, params))

    ref = reference_forward(x, w0, b0, w1, b1, w2, b2)
    np.testing.assert_allclose(np.asarray(out), np.asarray(ref),
                               rtol=1e-4, atol=1e-4)
    assert out.shape == (N, C, H, W)

    # Also exercise the 2-group (v7x-style) split for correctness.
    out2 = jax.block_until_ready(res_forward(x, params, num_groups=2))
    np.testing.assert_allclose(np.asarray(out2), np.asarray(ref),
                               rtol=1e-4, atol=1e-4)

    print("KERNEL_OK")
</pallas_src>

<mosaic_0001>
module attributes {stable_mosaic.version = 11 : i64} {
  func.func @res_kernel(%arg0: i32, %arg1: memref<1x4x512xf32, #tpu.memory_space<vmem>>, %arg2: memref<8x4xf32, #tpu.memory_space<vmem>>, %arg3: memref<8x1xf32, #tpu.memory_space<vmem>>, %arg4: memref<3x8x24xf32, #tpu.memory_space<vmem>>, %arg5: memref<8x1xf32, #tpu.memory_space<vmem>>, %arg6: memref<4x8xf32, #tpu.memory_space<vmem>>, %arg7: memref<4x1xf32, #tpu.memory_space<vmem>>, %arg8: memref<1x512xf32, #tpu.memory_space<vmem>>, %arg9: memref<1x512xf32, #tpu.memory_space<vmem>>, %arg10: memref<1x512xf32, #tpu.memory_space<vmem>>, %arg11: memref<1x512xf32, #tpu.memory_space<vmem>>, %arg12: memref<1x4x512xf32, #tpu.memory_space<vmem>>) attributes {dimension_semantics = [#tpu.dimension_semantics<parallel>], iteration_bounds = array<i64: 1>, scalar_prefetch = 0 : i64, scratch_operands = 0 : i64, tpu.core_type = #tpu.core_type<tc>, window_params = [{transform_indices = @transform_0, window_bounds = array<i64: 1, 4, 512>}, {pipeline_mode = #tpu.pipeline_mode<synchronous>, transform_indices = @transform_1, window_bounds = array<i64: 8, 4>}, {pipeline_mode = #tpu.pipeline_mode<synchronous>, transform_indices = @transform_2, window_bounds = array<i64: 8, 1>}, {pipeline_mode = #tpu.pipeline_mode<synchronous>, transform_indices = @transform_3, window_bounds = array<i64: 3, 8, 24>}, {pipeline_mode = #tpu.pipeline_mode<synchronous>, transform_indices = @transform_4, window_bounds = array<i64: 8, 1>}, {pipeline_mode = #tpu.pipeline_mode<synchronous>, transform_indices = @transform_5, window_bounds = array<i64: 4, 8>}, {pipeline_mode = #tpu.pipeline_mode<synchronous>, transform_indices = @transform_6, window_bounds = array<i64: 4, 1>}, {pipeline_mode = #tpu.pipeline_mode<synchronous>, transform_indices = @transform_7, window_bounds = array<i64: 1, 512>}, {pipeline_mode = #tpu.pipeline_mode<synchronous>, transform_indices = @transform_8, window_bounds = array<i64: 1, 512>}, {pipeline_mode = #tpu.pipeline_mode<synchronous>, transform_indices = @transform_9, window_bounds = array<i64: 1, 512>}, {pipeline_mode = #tpu.pipeline_mode<synchronous>, transform_indices = @transform_10, window_bounds = array<i64: 1, 512>}, {transform_indices = @transform_11, window_bounds = array<i64: 1, 4, 512>}]} {
    %c0 = arith.constant 0 : index
    %c0_0 = arith.constant 0 : index
    %c0_1 = arith.constant 0 : index
    %0 = vector.load %arg1[%c0, %c0_0, %c0_1] : memref<1x4x512xf32, #tpu.memory_space<vmem>>, vector<1x4x512xf32>
    %1 = vector.shape_cast %0 : vector<1x4x512xf32> to vector<4x512xf32>
    %c0_2 = arith.constant 0 : index
    %c0_3 = arith.constant 0 : index
    %2 = vector.load %arg2[%c0_2, %c0_3] : memref<8x4xf32, #tpu.memory_space<vmem>>, vector<8x4xf32>
    %cst = arith.constant dense<0.000000e+00> : vector<8x512xf32>
    %3 = tpu.matmul %2, %1, %cst {dimension_numbers = #tpu.dot_dimension_numbers<[1], [0], [0], [1], [0, 0, 1, 1], [], []>} : vector<8x4xf32>, vector<4x512xf32>, vector<8x512xf32> -> vector<8x512xf32>
    %c0_4 = arith.constant 0 : index
    %c0_5 = arith.constant 0 : index
    %4 = vector.load %arg3[%c0_4, %c0_5] : memref<8x1xf32, #tpu.memory_space<vmem>>, vector<8x1xf32>
    %5 = vector.broadcast %4 : vector<8x1xf32> to vector<8x512xf32>
    %6 = arith.addf %3, %5 : vector<8x512xf32>
    %cst_6 = arith.constant 0.000000e+00 : f32
    %7 = vector.broadcast %cst_6 : f32 to vector<8x512xf32>
    %8 = arith.cmpf oge, %6, %7 : vector<8x512xf32>
    %cst_7 = arith.constant 0.00999999977 : f32
    %9 = vector.broadcast %cst_7 : f32 to vector<8x512xf32>
    %10 = arith.mulf %9, %6 : vector<8x512xf32>
    %11 = arith.select %8, %6, %10 : vector<8x512xi1>, vector<8x512xf32>
    %c0_8 = arith.constant 0 : index
    %c0_9 = arith.constant 0 : index
    %12 = vector.load %arg8[%c0_8, %c0_9] : memref<1x512xf32, #tpu.memory_space<vmem>>, vector<1x512xf32>
    %cst_10 = arith.constant 5.000000e-01 : f32
    %13 = vector.broadcast %cst_10 : f32 to vector<1x512xf32>
    %14 = arith.cmpf ogt, %12, %13 : vector<1x512xf32>
    %c0_11 = arith.constant 0 : index
    %c0_12 = arith.constant 0 : index
    %15 = vector.load %arg9[%c0_11, %c0_12] : memref<1x512xf32, #tpu.memory_space<vmem>>, vector<1x512xf32>
    %cst_13 = arith.constant 5.000000e-01 : f32
    %16 = vector.broadcast %cst_13 : f32 to vector<1x512xf32>
    %17 = arith.cmpf ogt, %15, %16 : vector<1x512xf32>
    %c0_14 = arith.constant 0 : index
    %c0_15 = arith.constant 0 : index
    %18 = vector.load %arg10[%c0_14, %c0_15] : memref<1x512xf32, #tpu.memory_space<vmem>>, vector<1x512xf32>
    %cst_16 = arith.constant 5.000000e-01 : f32
    %19 = vector.broadcast %cst_16 : f32 to vector<1x512xf32>
    %20 = arith.cmpf ogt, %18, %19 : vector<1x512xf32>
    %c0_17 = arith.constant 0 : index
    %c0_18 = arith.constant 0 : index
    %21 = vector.load %arg11[%c0_17, %c0_18] : memref<1x512xf32, #tpu.memory_space<vmem>>, vector<1x512xf32>
    %cst_19 = arith.constant 5.000000e-01 : f32
    %22 = vector.broadcast %cst_19 : f32 to vector<1x512xf32>
    %23 = arith.cmpf ogt, %21, %22 : vector<1x512xf32>
    %c1_i32 = arith.constant 1 : i32
    %24 = tpu.dynamic_rotate %11 by %c1_i32 dim 1 : vector<8x512xf32>, i32 -> vector<8x512xf32>
    %25 = vector.shape_cast %14 : vector<1x512xi1> to vector<1x512xi1>
    %26 = vector.broadcast %25 : vector<1x512xi1> to vector<8x512xi1>
    %27 = arith.select %26, %11, %24 : vector<8x512xi1>, vector<8x512xf32>
    %c511_i32 = arith.constant 511 : i32
    %28 = tpu.dynamic_rotate %11 by %c511_i32 dim 1 : vector<8x512xf32>, i32 -> vector<8x512xf32>
    %29 = vector.shape_cast %17 : vector<1x512xi1> to vector<1x512xi1>
    %30 = vector.broadcast %29 : vector<1x512xi1> to vector<8x512xi1>
    %31 = arith.select %30, %11, %28 : vector<8x512xi1>, vector<8x512xf32>
    %c16_i32 = arith.constant 16 : i32
    %32 = tpu.dynamic_rotate %27 by %c16_i32 dim 1 : vector<8x512xf32>, i32 -> vector<8x512xf32>
    %33 = vector.shape_cast %20 : vector<1x512xi1> to vector<1x512xi1>
    %34 = vector.broadcast %33 : vector<1x512xi1> to vector<8x512xi1>
    %35 = arith.select %34, %27, %32 : vector<8x512xi1>, vector<8x512xf32>
    %c16_i32_20 = arith.constant 16 : i32
    %36 = tpu.dynamic_rotate %11 by %c16_i32_20 dim 1 : vector<8x512xf32>, i32 -> vector<8x512xf32>
    %37 = vector.shape_cast %20 : vector<1x512xi1> to vector<1x512xi1>
    %38 = vector.broadcast %37 : vector<1x512xi1> to vector<8x512xi1>
    %39 = arith.select %38, %11, %36 : vector<8x512xi1>, vector<8x512xf32>
    %c16_i32_21 = arith.constant 16 : i32
    %40 = tpu.dynamic_rotate %31 by %c16_i32_21 dim 1 : vector<8x512xf32>, i32 -> vector<8x512xf32>
    %41 = vector.shape_cast %20 : vector<1x512xi1> to vector<1x512xi1>
    %42 = vector.broadcast %41 : vector<1x512xi1> to vector<8x512xi1>
    %43 = arith.select %42, %31, %40 : vector<8x512xi1>, vector<8x512xf32>
    %44 = tpu.concatenate %35, %39, %43 in 0 : vector<8x512xf32>, vector<8x512xf32>, vector<8x512xf32> -> vector<24x512xf32>
    %c0_22 = arith.constant 0 : index
    %c0_23 = arith.constant 0 : index
    %c0_24 = arith.constant 0 : index
    %45 = vector.load %arg4[%c0_22, %c0_23, %c0_24] : memref<3x8x24xf32, #tpu.memory_space<vmem>>, vector<1x8x24xf32>
    %46 = vector.shape_cast %45 : vector<1x8x24xf32> to vector<8x24xf32>
    %cst_25 = arith.constant dense<0.000000e+00> : vector<8x512xf32>
    %47 = tpu.matmul %46, %44, %cst_25 {dimension_numbers = #tpu.dot_dimension_numbers<[1], [0], [0], [1], [0, 0, 1, 1], [], []>} : vector<8x24xf32>, vector<24x512xf32>, vector<8x512xf32> -> vector<8x512xf32>
    %48 = tpu.concatenate %27, %11, %31 in 0 : vector<8x512xf32>, vector<8x512xf32>, vector<8x512xf32> -> vector<24x512xf32>
    %c1 = arith.constant 1 : index
    %c0_26 = arith.constant 0 : index
    %c0_27 = arith.constant 0 : index
    %49 = vector.load %arg4[%c1, %c0_26, %c0_27] : memref<3x8x24xf32, #tpu.memory_space<vmem>>, vector<1x8x24xf32>
    %50 = vector.shape_cast %49 : vector<1x8x24xf32> to vector<8x24xf32>
    %cst_28 = arith.constant dense<0.000000e+00> : vector<8x512xf32>
    %51 = tpu.matmul %50, %48, %cst_28 {dimension_numbers = #tpu.dot_dimension_numbers<[1], [0], [0], [1], [0, 0, 1, 1], [], []>} : vector<8x24xf32>, vector<24x512xf32>, vector<8x512xf32> -> vector<8x512xf32>
    %52 = arith.addf %47, %51 : vector<8x512xf32>
    %c496_i32 = arith.constant 496 : i32
    %53 = tpu.dynamic_rotate %27 by %c496_i32 dim 1 : vector<8x512xf32>, i32 -> vector<8x512xf32>
    %54 = vector.shape_cast %23 : vector<1x512xi1> to vector<1x512xi1>
    %55 = vector.broadcast %54 : vector<1x512xi1> to vector<8x512xi1>
    %56 = arith.select %55, %27, %53 : vector<8x512xi1>, vector<8x512xf32>
    %c496_i32_29 = arith.constant 496 : i32
    %57 = tpu.dynamic_rotate %11 by %c496_i32_29 dim 1 : vector<8x512xf32>, i32 -> vector<8x512xf32>
    %58 = vector.shape_cast %23 : vector<1x512xi1> to vector<1x512xi1>
    %59 = vector.broadcast %58 : vector<1x512xi1> to vector<8x512xi1>
    %60 = arith.select %59, %11, %57 : vector<8x512xi1>, vector<8x512xf32>
    %c496_i32_30 = arith.constant 496 : i32
    %61 = tpu.dynamic_rotate %31 by %c496_i32_30 dim 1 : vector<8x512xf32>, i32 -> vector<8x512xf32>
    %62 = vector.shape_cast %23 : vector<1x512xi1> to vector<1x512xi1>
    %63 = vector.broadcast %62 : vector<1x512xi1> to vector<8x512xi1>
    %64 = arith.select %63, %31, %61 : vector<8x512xi1>, vector<8x512xf32>
    %65 = tpu.concatenate %56, %60, %64 in 0 : vector<8x512xf32>, vector<8x512xf32>, vector<8x512xf32> -> vector<24x512xf32>
    %c2 = arith.constant 2 : index
    %c0_31 = arith.constant 0 : index
    %c0_32 = arith.constant 0 : index
    %66 = vector.load %arg4[%c2, %c0_31, %c0_32] : memref<3x8x24xf32, #tpu.memory_space<vmem>>, vector<1x8x24xf32>
    %67 = vector.shape_cast %66 : vector<1x8x24xf32> to vector<8x24xf32>
    %cst_33 = arith.constant dense<0.000000e+00> : vector<8x512xf32>
    %68 = tpu.matmul %67, %65, %cst_33 {dimension_numbers = #tpu.dot_dimension_numbers<[1], [0], [0], [1], [0, 0, 1, 1], [], []>} : vector<8x24xf32>, vector<24x512xf32>, vector<8x512xf32> -> vector<8x512xf32>
    %69 = arith.addf %52, %68 : vector<8x512xf32>
    %c0_34 = arith.constant 0 : index
    %c0_35 = arith.constant 0 : index
    %70 = vector.load %arg5[%c0_34, %c0_35] : memref<8x1xf32, #tpu.memory_space<vmem>>, vector<8x1xf32>
    %71 = vector.broadcast %70 : vector<8x1xf32> to vector<8x512xf32>
    %72 = arith.addf %69, %71 : vector<8x512xf32>
    %cst_36 = arith.constant 0.000000e+00 : f32
    %73 = vector.broadcast %cst_36 : f32 to vector<8x512xf32>
    %74 = arith.cmpf oge, %72, %73 : vector<8x512xf32>
    %cst_37 = arith.constant 0.00999999977 : f32
    %75 = vector.broadcast %cst_37 : f32 to vector<8x512xf32>
    %76 = arith.mulf %75, %72 : vector<8x512xf32>
    %77 = arith.select %74, %72, %76 : vector<8x512xi1>, vector<8x512xf32>
    %c0_38 = arith.constant 0 : index
    %c0_39 = arith.constant 0 : index
    %78 = vector.load %arg6[%c0_38, %c0_39] : memref<4x8xf32, #tpu.memory_space<vmem>>, vector<4x8xf32>
    %cst_40 = arith.constant dense<0.000000e+00> : vector<4x512xf32>
    %79 = tpu.matmul %78, %77, %cst_40 {dimension_numbers = #tpu.dot_dimension_numbers<[1], [0], [0], [1], [0, 0, 1, 1], [], []>} : vector<4x8xf32>, vector<8x512xf32>, vector<4x512xf32> -> vector<4x512xf32>
    %c0_41 = arith.constant 0 : index
    %c0_42 = arith.constant 0 : index
    %80 = vector.load %arg7[%c0_41, %c0_42] : memref<4x1xf32, #tpu.memory_space<vmem>>, vector<4x1xf32>
    %81 = vector.broadcast %80 : vector<4x1xf32> to vector<4x512xf32>
    %82 = arith.addf %79, %81 : vector<4x512xf32>
    %cst_43 = arith.constant 0.000000e+00 : f32
    %83 = vector.broadcast %cst_43 : f32 to vector<4x512xf32>
    %84 = arith.cmpf oge, %82, %83 : vector<4x512xf32>
    %cst_44 = arith.constant 0.00999999977 : f32
    %85 = vector.broadcast %cst_44 : f32 to vector<4x512xf32>
    %86 = arith.mulf %85, %82 : vector<4x512xf32>
    %87 = arith.select %84, %82, %86 : vector<4x512xi1>, vector<4x512xf32>
    %88 = arith.addf %87, %1 : vector<4x512xf32>
    %c0_45 = arith.constant 0 : index
    %c0_46 = arith.constant 0 : index
    %c0_47 = arith.constant 0 : index
    %89 = vector.load %arg12[%c0_45, %c0_46, %c0_47] : memref<1x4x512xf32, #tpu.memory_space<vmem>>, vector<1x4x512xf32>
    %90 = vector.shape_cast %89 : vector<1x4x512xf32> to vector<4x512xf32>
    %91 = vector.shape_cast %88 : vector<4x512xf32> to vector<1x4x512xf32>
    tpu.vector_store %arg12[%c0_45, %c0_46, %c0_47], %91 {strides = array<i32>} : memref<1x4x512xf32, #tpu.memory_space<vmem>>, vector<1x4x512xf32>,
    return
  }
  func.func @transform_0(%arg0: i32) -> (i32, i32, i32) {
    %c0_i32 = arith.constant 0 : i32
    %c0_i32_0 = arith.constant 0 : i32
    %c0_i32_1 = arith.constant 0 : i32
    return %arg0, %c0_i32, %c0_i32_0 : i32, i32, i32
  }
  func.func @transform_1(%arg0: i32) -> (i32, i32) {
    %c0_i32 = arith.constant 0 : i32
    %c0_i32_0 = arith.constant 0 : i32
    %c0_i32_1 = arith.constant 0 : i32
    return %c0_i32, %c0_i32_0 : i32, i32
  }
  func.func @transform_2(%arg0: i32) -> (i32, i32) {
    %c0_i32 = arith.constant 0 : i32
    %c0_i32_0 = arith.constant 0 : i32
    %c0_i32_1 = arith.constant 0 : i32
    return %c0_i32, %c0_i32_0 : i32, i32
  }
  func.func @transform_3(%arg0: i32) -> (i32, i32, i32) {
    %c0_i32 = arith.constant 0 : i32
    %c0_i32_0 = arith.constant 0 : i32
    %c0_i32_1 = arith.constant 0 : i32
    %c0_i32_2 = arith.constant 0 : i32
    return %c0_i32, %c0_i32_0, %c0_i32_1 : i32, i32, i32
  }
  func.func @transform_4(%arg0: i32) -> (i32, i32) {
    %c0_i32 = arith.constant 0 : i32
    %c0_i32_0 = arith.constant 0 : i32
    %c0_i32_1 = arith.constant 0 : i32
    return %c0_i32, %c0_i32_0 : i32, i32
  }
  func.func @transform_5(%arg0: i32) -> (i32, i32) {
    %c0_i32 = arith.constant 0 : i32
    %c0_i32_0 = arith.constant 0 : i32
    %c0_i32_1 = arith.constant 0 : i32
    return %c0_i32, %c0_i32_0 : i32, i32
  }
  func.func @transform_6(%arg0: i32) -> (i32, i32) {
    %c0_i32 = arith.constant 0 : i32
    %c0_i32_0 = arith.constant 0 : i32
    %c0_i32_1 = arith.constant 0 : i32
    return %c0_i32, %c0_i32_0 : i32, i32
  }
  func.func @transform_7(%arg0: i32) -> (i32, i32) {
    %c0_i32 = arith.constant 0 : i32
    %c0_i32_0 = arith.constant 0 : i32
    %c0_i32_1 = arith.constant 0 : i32
    return %c0_i32, %c0_i32_0 : i32, i32
  }
  func.func @transform_8(%arg0: i32) -> (i32, i32) {
    %c0_i32 = arith.constant 0 : i32
    %c0_i32_0 = arith.constant 0 : i32
    %c0_i32_1 = arith.constant 0 : i32
    return %c0_i32, %c0_i32_0 : i32, i32
  }
  func.func @transform_9(%arg0: i32) -> (i32, i32) {
    %c0_i32 = arith.constant 0 : i32
    %c0_i32_0 = arith.constant 0 : i32
    %c0_i32_1 = arith.constant 0 : i32
    return %c0_i32, %c0_i32_0 : i32, i32
  }
  func.func @transform_10(%arg0: i32) -> (i32, i32) {
    %c0_i32 = arith.constant 0 : i32
    %c0_i32_0 = arith.constant 0 : i32
    %c0_i32_1 = arith.constant 0 : i32
    return %c0_i32, %c0_i32_0 : i32, i32
  }
  func.func @transform_11(%arg0: i32) -> (i32, i32, i32) {
    %c0_i32 = arith.constant 0 : i32
    %c0_i32_0 = arith.constant 0 : i32
    %c0_i32_1 = arith.constant 0 : i32
    return %arg0, %c0_i32, %c0_i32_0 : i32, i32, i32
  }
}

</mosaic_0001>

<bundles_post_ra>
// kernel: _res_pallas.1
= control target key start
LH: loop header
LB: loop body
LE: loop exit
PB: predicated region body
PF: predicated region fallthrough
CT: control target
= control target key end

     0   :  { %v862_v2 = vmov 0   ;;  %vm60_vm0 = vcmask 1043456   ;;  %vm56_vm1 = vcmask 31744   ;;  %v177_v33 = vlaneseq  ;;  %s1275_s0 = inlined_call_operand.vmem [shape: f32[1,4,512], index: 0, kind: input, shape index: {}]   ;;  %s1276_s2 = inlined_call_operand.vmem [shape: f32[8,1], index: 2, kind: input, shape index: {}]   ;;  %s1277_s1 = inlined_call_operand.vmem [shape: f32[8,4], index: 1, kind: input, shape index: {}]   ;;  %s1278_s8 = inlined_call_operand.vmem [shape: f32[1,512], index: 8, kind: input, shape index: {}]   ;;  %s1279_s7 = inlined_call_operand.vmem [shape: f32[1,512], index: 7, kind: input, shape index: {}]   ;;  %s1280_s4 = inlined_call_operand.vmem [shape: f32[8,1], index: 4, kind: input, shape index: {}]   ;;  %s1281_s9 = inlined_call_operand.vmem [shape: f32[1,512], index: 9, kind: input, shape index: {}]   ;;  %s1282_s3 = inlined_call_operand.vmem [shape: f32[3,8,24], index: 3, kind: input, shape index: {}]   ;;  %s1283_s10 = inlined_call_operand.vmem [shape: f32[1,512], index: 10, kind: input, shape index: {}]   ;;  %s1284_s6 = inlined_call_operand.vmem [shape: f32[4,1], index: 6, kind: input, shape index: {}]   ;;  %s1285_s5 = inlined_call_operand.vmem [shape: f32[4,8], index: 5, kind: input, shape index: {}]   ;;  %s1286_s11 = inlined_call_operand.vmem [shape: f32[1,4,512], index: 11, kind: output, shape index: {}]  }
   0x1   :  { %v39_v0 = vld [vmem:[%s1275_s0 + $0x8] sm:$0xff]  ;;  %v38_v1 = vld [vmem:[%s1275_s0] sm:$0xff]  ;;  %785 = vset.pattern.permute.xlu0 %v862_v2  ;;  %861 = vset.pattern.permute.xlu1 %v862_v2  ;;  %s863_s0 = smov 127  }
   0x2   :  { %51 = vst [vmem:[#allocation1 + $0x10] ss:$2 sm:$0xff] %v39_v0  ;;  %v41_v3 = vld [vmem:[%s1276_s2] sm:$0xff]  ;;  %s865_s2 = smov 16   ;;  %v971_v35 = vand.u32 127, %v177_v33 }
   0x3   :  { %49 = vst [vmem:[#allocation1] ss:$2 sm:$0xff] %v38_v1  ;;  %44 = vperm.xlu0 %785, %v41_v3   ;;  %v40_v4 = vld [vmem:[%s1277_s1] sm:$0xff]  ;;  %s864_s1 = smov 1  }
   0x4   :  { %v163_v31 = vld [vmem:[%s1278_s8] sm:$0xf]  ;;  %vm179_vm8 = vcmp.lt.s32.totalorder %v971_v35, 1  ;;  %vm205_vm9 = vcmp.lt.s32.totalorder %v971_v35, 127 }
   0x5   :  { %vm164_vm6 = vcmp.gt.f32.partialorder %v163_v31, 0.5  ;;  %v161_v32 = vld [vmem:[%s1279_s7] sm:$0xf]  ;;  %s866_s7 = smov 112  }
   0x6   :  { %v210_v34 = vsel %vm164_vm6, 1, %v862_v2  ;;  %vm162_vm7 = vcmp.gt.f32.partialorder %v161_v32, 0.5 }
   0x7   :  { %v211_v36 = vperm.slane %v210_v34, 0  ;;  %v212_v37 = vperm.slane %v210_v34, 1  ;;  %v213_v38 = vperm.slane %v210_v34, 2  ;;  %v184_v39 = vsel %vm162_vm7, 1, %v862_v2 }
   0x8   :  { %v214_v40 = vperm.slane %v210_v34, 3  ;;  %v185_v44 = vperm.slane %v184_v39, 0  ;;  %v186_v52 = vperm.slane %v184_v39, 1  ;;  %v187_v53 = vperm.slane %v184_v39, 2 }
   0x9   :  { %v54_v5 = vld.sshfl [vmem:[#allocation1 + $0x10] sm:$0xff pattern:$0x75316420]  ;;  %v55_v6 = vld.sshfl [vmem:[#allocation1 + $0x18] sm:$0xff pattern:$0x75316420] }
   0xa   :  { %758 = vmatpush.msk.msra.mxu2 %vm60_vm0, %v54_v5  ;;  %760 = vmatpush.msk.msra.mxu3 %vm60_vm0, %v55_v6  ;;  %725 = vst [vmem:[#allocation1 + $0x10] ss:$2 sm:$0xff] %v39_v0  ;;  %v52_v7 = vld.sshfl [vmem:[#allocation1] sm:$0xff pattern:$0x75316420]  ;;  %vm976_vm10 = vcmp.eq.s32.totalorder %v211_v36, 1 }
   0xb   :  { %759 = vmatmul.msk.f32.vlgmr.msra.gmra.mxu2 %vm56_vm1, %v40_v4  ;;  %761 = vmatmul.msk.f32.vlgmr.msra.gmra.mxu3 %vm56_vm1, %v40_v4  ;;  %v53_v8 = vld.sshfl [vmem:[#allocation1 + $0x8] sm:$0xff pattern:$0x75316420]  ;;  %vm216_vm11 = vcmp.eq.s32.totalorder %v212_v37, 1  ;;  %vm217_vm12 = vcmp.eq.s32.totalorder %v213_v38, 1  ;;  %vm218_vm13 = vcmp.eq.s32.totalorder %v214_v40, 1 }
   0xc   :  { %754 = vmatpush.msk.msra.mxu0 %vm60_vm0, %v52_v7  ;;  %756 = vmatpush.msk.msra.mxu1 %vm60_vm0, %v53_v8  ;;  %723 = vst [vmem:[#allocation1] ss:$2 sm:$0xff] %v38_v1  ;;  %v188_v54 = vperm.slane %v184_v39, 3  ;;  %vm189_vm14 = vcmp.eq.s32.totalorder %v185_v44, 1  ;;  %vm190_vm15 = vcmp.eq.s32.totalorder %v186_v52, 1 }
   0xd   :  { %755 = vmatmul.msk.f32.vlgmr.msra.gmra.mxu0 %vm56_vm1, %v40_v4  ;;  %757 = vmatmul.msk.f32.vlgmr.msra.gmra.mxu1 %vm56_vm1, %v40_v4  ;;  %vm191_vm1 = vcmp.eq.s32.totalorder %v187_v53, 1  ;;  %v167_v44 = vld [vmem:[%s1283_s10] sm:$0xf] }
   0xe   :  { %vm168_vm7 = vcmp.gt.f32.partialorder %v167_v44, 0.5 }
   0xf   :  { %v1100_v52 = vsel %vm168_vm7, 1, %v862_v2 }
  0x75   :  { %v45_v9 = vpop.permute.xlu0 %44 }
  0x8a   :  { %v86_v10 = vpop.f32.mrf.mxu0  ;;  %v106_v11 = vpop.f32.mrf.mxu1 }
  0x8b   :  { %v87_v12 = vadd.f32 %v86_v10, %v45_v9  ;;  %v107_v13 = vadd.f32 %v106_v11, %v45_v9 }
  0x8d   :  { %v153_v16 = vmul.f32 0.01, %v87_v12  ;;  %v154_v17 = vmul.f32 0.01, %v107_v13  ;;  %vm149_vm2 = vcmp.ge.f32.partialorder %v87_v12, 0.0  ;;  %vm150_vm3 = vcmp.ge.f32.partialorder %v107_v13, 0.0 }
  0x8e   :  { %v126_v14 = vpop.f32.mrf.mxu2  ;;  %v146_v15 = vpop.f32.mrf.mxu3 }
  0x8f   :  { %v127_v18 = vadd.f32 %v126_v14, %v45_v9  ;;  %v147_v19 = vadd.f32 %v146_v15, %v45_v9  ;;  %v945_v22 = vsel %vm149_vm2, %v87_v12, %v153_v16  ;;  %v947_v23 = vsel %vm150_vm3, %v107_v13, %v154_v17 }
  0x90   :  { %vm192_vm2 = vcmp.eq.s32.totalorder %v188_v54, 1 }
  0x91   :  { %vm151_vm4 = vcmp.ge.f32.partialorder %v127_v18, 0.0  ;;  %v155_v20 = vmul.f32 0.01, %v127_v18  ;;  %vm152_vm5 = vcmp.ge.f32.partialorder %v147_v19, 0.0  ;;  %v156_v21 = vmul.f32 0.01, %v147_v19 }
  0x93   :  { %v949_v24 = vsel %vm151_vm4, %v127_v18, %v155_v20  ;;  %v951_v25 = vsel %vm152_vm5, %v147_v19, %v156_v21  ;;  %v598_v20 = vld [vmem:[%s1280_s4] sm:$0xff]  ;;  %vm284_vm4 = vcmask 195584   ;;  %vm231_vm5 = vcmp.lt.s32.totalorder %v971_v35, 16 }
  0x94   :  { %v791_v26 = vpack.i.bf16 %v947_v23, %v951_v25  ;;  %v801_v27 = vpack.i.bf16 %v945_v22, %v951_v25  ;;  %v786_v28 = vpack.i.bf16 %v949_v24, %v945_v22  ;;  %v796_v29 = vpack.i.bf16 %v949_v24, %v947_v23 }
  0x95   :  { %v806_v30 = vpack.i.bf16 %v951_v25, %v949_v24  ;;  %v831_v17 = vpack.i.bf16 %v951_v25, %v945_v22 }
  0x96   :  { %792 = vrot.lane.b32.xlu1 %v791_v26, %s863_s0  ;;  %802 = vrot.lane.b32.xlu2 %v801_v27, %s864_s1  ;;  %v165_v26 = vld [vmem:[%s1281_s9] sm:$0xf]  ;;  %v762_v27 = vld [vmem:[%s1282_s3 + $0x8] sm:$0xff] }
  0x97   :  { %787 = vrot.lane.b32.xlu0 %v786_v28, %s863_s0  ;;  %vm166_vm3 = vcmp.gt.f32.partialorder %v165_v26, 0.5 }
  0x9e   :  { %797 = vrot.lane.b32.xlu1 %v796_v29, %s864_s1  ;;  %v236_v29 = vsel %vm166_vm3, 1, %v862_v2 }
  0x9f   :  { %807 = vrot.lane.b32.xlu0 %v806_v30, %s865_s2  ;;  %v240_v32 = vperm.slane %v236_v29, 3 }
  0xa1   :  { %vm1076_vm6 = vcmp.eq.s32.totalorder %v240_v32, 1 }
  0xf0   :  { %v803_v41 = vpop.permute.xlu2 %802 }
  0xf1   :  { %v805_v48 = vunpack.i.h.bf16 %v803_v41  ;;  %v804_v51 = vunpack.i.l.bf16 %v803_v41 }
  0xf3   :  { %v183_v0 = vsel %vm179_vm8, %v804_v51, %v805_v48 }
  0xf4   :  { %v1016_v5 = vsel %vm189_vm14, %v945_v22, %v183_v0 }
  0xf5   :  { %v851_v19 = vpack.i.bf16 %v1016_v5, %v945_v22 }
 0x108   :  { %v793_v42 = vpop.permute.xlu1 %792 }
 0x109   :  { %v795_v45 = vunpack.i.h.bf16 %v793_v42  ;;  %v794_v46 = vunpack.i.l.bf16 %v793_v42  ;;  %v788_v47 = vpop.permute.xlu0 %787 }
 0x10a   :  { %v790_v49 = vunpack.i.h.bf16 %v788_v47  ;;  %v789_v50 = vunpack.i.l.bf16 %v788_v47  ;;  %v237_v47 = vperm.slane %v236_v29, 0 }
 0x10c   :  { %v206_v55 = vsel %vm205_vm9, %v790_v49, %v794_v46  ;;  %v207_v56 = vsel %vm205_vm9, %v795_v45, %v790_v49  ;;  %v208_v57 = vsel %vm205_vm9, %v789_v50, %v795_v45  ;;  %v209_v58 = vsel %vm205_vm9, %v794_v46, %v789_v50 }
 0x10d   :  { %v991_v59 = vsel %vm976_vm10, %v945_v22, %v208_v57  ;;  %v994_v60 = vsel %vm216_vm11, %v947_v23, %v207_v56  ;;  %v997_v61 = vsel %vm217_vm12, %v949_v24, %v206_v55  ;;  %v1000_v62 = vsel %vm218_vm13, %v951_v25, %v209_v58  ;;  %v771_v57 = vld [vmem:[%s1282_s3 + $0x10] sm:$0xff] }
 0x10e   :  { %301 = vmatpush.msrb.mxu0 %v991_v59  ;;  %321 = vmatpush.msrb.mxu1 %v994_v60  ;;  %v816_v63 = vpack.i.bf16 %v1000_v62, %v997_v61  ;;  %v836_v15 = vpack.i.bf16 %v1000_v62, %v991_v59  ;;  %v841_v16 = vpack.i.bf16 %v1016_v5, %v997_v61  ;;  %v239_v46 = vperm.slane %v236_v29, 2 }
 0x10f   :  { %341 = vmatpush.msrb.mxu2 %v997_v61  ;;  %361 = vmatpush.msrb.mxu3 %v1000_v62  ;;  %v856_v21 = vpack.i.bf16 %v947_v23, %v994_v60  ;;  %vm1102_vm9 = vcmp.eq.s32.totalorder %v237_v47, 1  ;;  %vm459_vm11 = vcmp.lt.s32.totalorder %v971_v35, 112 }
 0x110   :  { %322 = vmatpush.msrb.mxu1 %v947_v23  ;;  %817 = vrot.lane.b32.xlu2 %v816_v63, %s865_s2  ;;  %v798_v1 = vpop.permute.xlu1 %797 }
 0x111   :  { %342 = vmatpush.msrb.mxu2 %v949_v24  ;;  %302 = vmatpush.msrb.mxu0 %v945_v22  ;;  %v800_v3 = vunpack.i.h.bf16 %v798_v1  ;;  %v799_v4 = vunpack.i.l.bf16 %v798_v1  ;;  %v808_v28 = vpop.permute.xlu0 %807 }
 0x112   :  { %362 = vmatpush.msrb.mxu3 %v951_v25  ;;  %v810_v30 = vunpack.i.h.bf16 %v808_v28  ;;  %v809_v31 = vunpack.i.l.bf16 %v808_v28  ;;  %v468_v28 = vperm.slane %v1100_v52, 3 }
 0x113   :  { %v180_v6 = vsel %vm179_vm8, %v800_v3, %v804_v51  ;;  %v181_v7 = vsel %vm179_vm8, %v799_v4, %v800_v3  ;;  %v182_v8 = vsel %vm179_vm8, %v805_v48, %v799_v4  ;;  %303 = vmatpush.msrb.mxu0 %v1016_v5  ;;  %v238_v48 = vperm.slane %v236_v29, 1 }
 0x114   :  { %v1026_v9 = vsel %vm190_vm15, %v947_v23, %v182_v8  ;;  %v1029_v10 = vsel %vm191_vm1, %v949_v24, %v181_v7  ;;  %v1032_v11 = vsel %vm192_vm2, %v951_v25, %v180_v6  ;;  %763 = vmatmul.msk.f32.vlgmr.msrb.gmra.mxu0 %vm284_vm4, %v762_v27  ;;  %v257_v39 = vsel %vm231_vm5, %v809_v31, %v810_v30 }
 0x115   :  { %323 = vmatpush.msrb.mxu1 %v1026_v9  ;;  %343 = vmatpush.msrb.mxu2 %v1029_v10  ;;  %v821_v12 = vpack.i.bf16 %v1029_v10, %v994_v60  ;;  %v826_v13 = vpack.i.bf16 %v947_v23, %v1032_v11  ;;  %v811_v14 = vpack.i.bf16 %v991_v59, %v1026_v9  ;;  %vm1095_vm8 = vcmp.eq.s32.totalorder %v239_v46, 1 }
 0x116   :  { %363 = vmatpush.msrb.mxu3 %v1032_v11  ;;  %v846_v18 = vpack.i.bf16 %v949_v24, %v1032_v11  ;;  %765 = vmatmul.msk.f32.vlgmr.msrb.gmra.mxu2 %vm284_vm4, %v762_v27  ;;  %v264_v41 = vsel %vm1076_vm6, %v951_v25, %v257_v39  ;;  %vm1106_vm10 = vcmp.eq.s32.totalorder %v238_v48, 1  ;;  %v467_v7 = vperm.slane %v1100_v52, 2 }
 0x117   :  { %822 = vrot.lane.b32.xlu1 %v821_v12, %s865_s2  ;;  %812 = vrot.lane.b32.xlu0 %v811_v14, %s865_s2  ;;  %vm1176_vm13 = vcmp.eq.s32.totalorder %v468_v28, 1  ;;  %vm627_vm2 = vcmask 64512  }
 0x118   :  { %827 = vrot.lane.b32.xlu2 %v826_v13, %s865_s2  ;;  %766 = vmatmul.msk.f32.vlgmr.msrb.gmra.mxu3 %vm284_vm4, %v762_v27  ;;  %vm1166_vm12 = vcmp.eq.s32.totalorder %v467_v7, 1 }
 0x119   :  { %764 = vmatmul.msk.f32.vlgmr.msrb.gmra.mxu1 %vm284_vm4, %v762_v27 }
 0x11f   :  { %837 = vrot.lane.b32.xlu1 %v836_v15, %s866_s7  ;;  %842 = vrot.lane.b32.xlu0 %v841_v16, %s866_s7 }
 0x120   :  { %832 = vrot.lane.b32.xlu2 %v831_v17, %s866_s7 }
 0x127   :  { %847 = vrot.lane.b32.xlu1 %v846_v18, %s866_s7  ;;  %455 = vrot.lane.b32.xlu0 %v1029_v10, %s866_s7 }
 0x128   :  { %852 = vrot.lane.b32.xlu2 %v851_v19, %s865_s2  ;;  %v281_v19 = vld [vmem:[%s1282_s3] sm:$0xff] }
 0x12f   :  { %857 = vrot.lane.b32.xlu1 %v856_v21, %s866_s7  ;;  %601 = vperm.xlu0 %785, %v598_v20  }
 0x130   :  { %453 = vrot.lane.b32.xlu2 %v1026_v9, %s866_s7 }
 0x16a   :  { %v818_v33 = vpop.permute.xlu2 %817 }
 0x16b   :  { %v820_v34 = vunpack.i.h.bf16 %v818_v33  ;;  %v819_v36 = vunpack.i.l.bf16 %v818_v33 }
 0x16d   :  { %v273_v38 = vsel %vm231_vm5, %v819_v36, %v820_v34 }
 0x16e   :  { %v280_v40 = vsel %vm1076_vm6, %v1000_v62, %v273_v38 }
 0x16f   :  { %444 = vmatpush.msra.mxu3 %v280_v40 }
 0x171   :  { %445 = vmatpush.msra.mxu3 %v264_v41 }
 0x172   :  { %v828_v42 = vpop.permute.xlu2 %827 }
 0x173   :  { %v830_v49 = vunpack.i.h.bf16 %v828_v42  ;;  %v829_v53 = vunpack.i.l.bf16 %v828_v42 }
 0x175   :  { %v258_v6 = vsel %vm231_vm5, %v830_v49, %v809_v31 }
 0x176   :  { %v263_v32 = vsel %vm1095_vm8, %v949_v24, %v258_v6 }
 0x17a   :  { %v1090_v43 = vpop.permute.xlu2 %832 }
 0x17b   :  { %v835_v29 = vunpack.i.h.bf16 %v1090_v43 }
 0x182   :  { %v853_v45 = vpop.permute.xlu2 %852 }
 0x183   :  { %v854_v50 = vunpack.i.l.bf16 %v853_v45  ;;  %v855_v54 = vunpack.i.h.bf16 %v853_v45 }
 0x185   :  { %v260_v2 = vsel %vm231_vm5, %v810_v30, %v854_v50  ;;  %v259_v4 = vsel %vm231_vm5, %v854_v50, %v830_v49  ;;  %v235_v20 = vsel %vm231_vm5, %v829_v53, %v855_v54  ;;  %v834_v30 = vunpack.i.l.bf16 %v1090_v43 }
 0x186   :  { %v261_v26 = vsel %vm1102_vm9, %v945_v22, %v260_v2  ;;  %v262_v31 = vsel %vm1106_vm10, %v947_v23, %v259_v4 }
 0x187   :  { %v488_v46 = vsel %vm459_vm11, %v835_v29, %v834_v30 }
 0x188   :  { %v492_v49 = vsel %vm1176_vm13, %v951_v25, %v488_v46 }
 0x189   :  { %v823_v55 = vpop.permute.xlu1 %822  ;;  %v813_v56 = vpop.permute.xlu0 %812 }
 0x18a   :  { %v825_v63 = vunpack.i.h.bf16 %v823_v55  ;;  %v824_v0 = vunpack.i.l.bf16 %v823_v55  ;;  %v815_v1 = vunpack.i.h.bf16 %v813_v56  ;;  %v814_v3 = vunpack.i.l.bf16 %v813_v56 }
 0x18c   :  { %v276_v8 = vsel %vm231_vm5, %v820_v34, %v815_v1  ;;  %v275_v12 = vsel %vm231_vm5, %v815_v1, %v824_v0  ;;  %v274_v13 = vsel %vm231_vm5, %v824_v0, %v819_v36  ;;  %v232_v14 = vsel %vm231_vm5, %v825_v63, %v829_v53 }
 0x18d   :  { %v277_v15 = vsel %vm1102_vm9, %v991_v59, %v276_v8  ;;  %v278_v16 = vsel %vm1106_vm10, %v994_v60, %v275_v12  ;;  %v279_v17 = vsel %vm1095_vm8, %v997_v61, %v274_v13  ;;  %v248_v18 = vsel %vm1076_vm6, %v1032_v11, %v232_v14  ;;  %v454_v8 = vpop.permute.xlu2 %453 }
 0x18e   :  { %384 = vmatpush.msra.mxu0 %v277_v15  ;;  %404 = vmatpush.msra.mxu1 %v278_v16  ;;  %v234_v21 = vsel %vm231_vm5, %v855_v54, %v814_v3  ;;  %v233_v27 = vsel %vm231_vm5, %v814_v3, %v825_v63  ;;  %v245_v36 = vsel %vm1102_vm9, %v1016_v5, %v235_v20  ;;  %v465_v0 = vperm.slane %v1100_v52, 0 }
 0x18f   :  { %424 = vmatpush.msra.mxu2 %v279_v17  ;;  %446 = vmatpush.msra.mxu3 %v248_v18  ;;  %v246_v37 = vsel %vm1106_vm10, %v1026_v9, %v234_v21  ;;  %v247_v42 = vsel %vm1095_vm8, %v1029_v10, %v233_v27  ;;  %v466_v1 = vperm.slane %v1100_v52, 1 }
 0x190   :  { %770 = vmatmul.msk.f32.vlgmr.msra.gmra.mxu3 %vm284_vm4, %v281_v19  ;;  %385 = vmatpush.msra.mxu0 %v261_v26  ;;  %vm1217_vm14 = vcmp.eq.s32.totalorder %v465_v0, 1 }
 0x191   :  { %405 = vmatpush.msra.mxu1 %v262_v31  ;;  %425 = vmatpush.msra.mxu2 %v263_v32  ;;  %v838_v33 = vpop.permute.xlu1 %837  ;;  %v843_v34 = vpop.permute.xlu0 %842  ;;  %vm1221_vm15 = vcmp.eq.s32.totalorder %v466_v1, 1 }
 0x192   :  { %v840_v39 = vunpack.i.h.bf16 %v838_v33  ;;  %v839_v40 = vunpack.i.l.bf16 %v838_v33  ;;  %v844_v41 = vunpack.i.l.bf16 %v843_v34  ;;  %386 = vmatpush.msra.mxu0 %v245_v36  ;;  %v845_v51 = vunpack.i.h.bf16 %v843_v34 }
 0x193   :  { %406 = vmatpush.msra.mxu1 %v246_v37  ;;  %426 = vmatpush.msra.mxu2 %v247_v42 }
 0x194   :  { %769 = vmatmul.msk.f32.vlgmr.msra.gmra.mxu2 %vm284_vm4, %v281_v19  ;;  %v501_v43 = vsel %vm459_vm11, %v844_v41, %v840_v39  ;;  %v504_v45 = vsel %vm459_vm11, %v840_v39, %v839_v40  ;;  %768 = vmatmul.msk.f32.vlgmr.msra.gmra.mxu1 %vm284_vm4, %v281_v19  ;;  %v462_v15 = vsel %vm459_vm11, %v845_v51, %v454_v8 }
 0x195   :  { %v507_v47 = vsel %vm1166_vm12, %v997_v61, %v501_v43  ;;  %v508_v48 = vsel %vm1176_vm13, %v1000_v62, %v504_v45  ;;  %767 = vmatmul.msk.f32.vlgmr.msra.gmra.mxu0 %vm284_vm4, %v281_v19  ;;  %v305_v19 = vpop.f32.mrf.mxu0 }
 0x196   :  { %567 = vmatpush.msrb.mxu2 %v507_v47  ;;  %587 = vmatpush.msrb.mxu3 %v508_v48  ;;  %v325_v18 = vpop.f32.mrf.mxu1 }
 0x198   :  { %588 = vmatpush.msrb.mxu3 %v492_v49 }
 0x199   :  { %v848_v50 = vpop.permute.xlu1 %847  ;;  %v456_v55 = vpop.permute.xlu0 %455 }
 0x19a   :  { %v850_v53 = vunpack.i.h.bf16 %v848_v50  ;;  %v849_v54 = vunpack.i.l.bf16 %v848_v50  ;;  %v461_v14 = vsel %vm459_vm11, %v454_v8, %v456_v55  ;;  %v345_v35 = vpop.f32.mrf.mxu2 }
 0x19b   :  { %v474_v17 = vsel %vm1221_vm15, %v1026_v9, %v461_v14 }
 0x19c   :  { %v460_v61 = vsel %vm459_vm11, %v456_v55, %v849_v54  ;;  %v485_v62 = vsel %vm459_vm11, %v850_v53, %v835_v29  ;;  %v463_v56 = vsel %vm459_vm11, %v849_v54, %v845_v51 }
 0x19d   :  { %v491_v25 = vsel %vm1166_vm12, %v949_v24, %v485_v62  ;;  %v476_v58 = vsel %vm1176_vm13, %v1032_v11, %v463_v56  ;;  %v475_v63 = vsel %vm1166_vm12, %v1029_v10, %v460_v61 }
 0x19e   :  { %568 = vmatpush.msrb.mxu2 %v491_v25  ;;  %589 = vmatpush.msrb.mxu3 %v476_v58  ;;  %v727_v25 = vld.sshfl [vmem:[#allocation1 + $0x8] sm:$0xff pattern:$0x75316420]  ;;  %v729_v58 = vld.sshfl [vmem:[#allocation1 + $0x18] sm:$0xff pattern:$0x75316420] }
 0x19f   :  { %775 = vmatmul.msk.f32.vlgmr.msrb.gmra.mxu3 %vm284_vm4, %v771_v57 }
 0x1a0   :  { %569 = vmatpush.msrb.mxu2 %v475_v63 }
 0x1a1   :  { %v858_v3 = vpop.permute.xlu1 %857  ;;  %774 = vmatmul.msk.f32.vlgmr.msrb.gmra.mxu2 %vm284_vm4, %v771_v57 }
 0x1a2   :  { %v860_v24 = vunpack.i.h.bf16 %v858_v3  ;;  %v859_v2 = vunpack.i.l.bf16 %v858_v3 }
 0x1a4   :  { %v503_v10 = vsel %vm459_vm11, %v839_v40, %v859_v2  ;;  %v502_v52 = vsel %vm459_vm11, %v859_v2, %v844_v41  ;;  %v487_v6 = vsel %vm459_vm11, %v834_v30, %v860_v24  ;;  %v486_v7 = vsel %vm459_vm11, %v860_v24, %v850_v53  ;;  %v602_v30 = vpop.permute.xlu0 %601  ;;  %v620_v41 = vld [vmem:[%s1285_s5] sm:$0xf] }
 0x1a5   :  { %v505_v12 = vsel %vm1217_vm14, %v991_v59, %v503_v10  ;;  %v506_v13 = vsel %vm1221_vm15, %v994_v60, %v502_v52  ;;  %v489_v16 = vsel %vm1217_vm14, %v945_v22, %v487_v6  ;;  %v490_v59 = vsel %vm1221_vm15, %v947_v23, %v486_v7  ;;  %v365_v22 = vpop.f32.mrf.mxu3  ;;  %v621_v23 = vld [vmem:[%s1284_s6] sm:$0xf] }
 0x1a6   :  { %527 = vmatpush.msrb.mxu0 %v505_v12  ;;  %547 = vmatpush.msrb.mxu1 %v506_v13  ;;  %v473_v60 = vsel %vm1217_vm14, %v1016_v5, %v462_v15  ;;  %v726_v10 = vld.sshfl [vmem:[#allocation1] sm:$0xff pattern:$0x75316420]  ;;  %v728_v12 = vld.sshfl [vmem:[#allocation1 + $0x10] sm:$0xff pattern:$0x75316420] }
 0x1a7   :  { %624 = vperm.xlu1 %861, %v621_v23  }
 0x1a8   :  { %528 = vmatpush.msrb.mxu0 %v489_v16  ;;  %548 = vmatpush.msrb.mxu1 %v490_v59 }
 0x1aa   :  { %529 = vmatpush.msrb.mxu0 %v473_v60  ;;  %549 = vmatpush.msrb.mxu1 %v474_v17 }
 0x1ab   :  { %772 = vmatmul.msk.f32.vlgmr.msrb.gmra.mxu0 %vm284_vm4, %v771_v57  ;;  %773 = vmatmul.msk.f32.vlgmr.msrb.gmra.mxu1 %vm284_vm4, %v771_v57 }
 0x211   :  { %v408_v21 = vpop.f32.mrf.mxu1 }
 0x212   :  { %v388_v26 = vpop.f32.mrf.mxu0  ;;  %v409_v34 = vadd.f32 %v408_v21, %v325_v18 }
 0x213   :  { %v448_v5 = vpop.f32.mrf.mxu3  ;;  %v389_v36 = vadd.f32 %v388_v26, %v305_v19 }
 0x214   :  { %v449_v9 = vadd.f32 %v448_v5, %v365_v22 }
 0x217   :  { %v428_v20 = vpop.f32.mrf.mxu2 }
 0x218   :  { %v429_v28 = vadd.f32 %v428_v20, %v345_v35 }
 0x219   :  { %v625_v54 = vpop.permute.xlu1 %624 }
 0x222   :  { %v591_v27 = vpop.f32.mrf.mxu3 }
 0x223   :  { %v597_v29 = vadd.f32 %v591_v27, %v449_v9 }
 0x224   :  { %v571_v31 = vpop.f32.mrf.mxu2 }
 0x225   :  { %v607_v32 = vadd.f32 %v602_v30, %v597_v29  ;;  %v596_v33 = vadd.f32 %v571_v31, %v429_v28 }
 0x227   :  { %v615_v37 = vmul.f32 0.01, %v607_v32  ;;  %v606_v38 = vadd.f32 %v602_v30, %v596_v33  ;;  %vm611_vm1 = vcmp.ge.f32.partialorder %v607_v32, 0.0 }
 0x228   :  { %v531_v39 = vpop.f32.mrf.mxu0  ;;  %v551_v40 = vpop.f32.mrf.mxu1 }
 0x229   :  { %v614_v42 = vmul.f32 0.01, %v606_v38  ;;  %v594_v43 = vadd.f32 %v531_v39, %v389_v36  ;;  %v595_v44 = vadd.f32 %v551_v40, %v409_v34  ;;  %v619_v45 = vsel %vm611_vm1, %v607_v32, %v615_v37 }
 0x22a   :  { %706 = vmatpush.msra.mxu3 %v619_v45  ;;  %vm610_vm3 = vcmp.ge.f32.partialorder %v606_v38, 0.0 }
 0x22b   :  { %v604_v46 = vadd.f32 %v602_v30, %v594_v43  ;;  %v605_v47 = vadd.f32 %v602_v30, %v595_v44  ;;  %v618_v48 = vsel %vm610_vm3, %v606_v38, %v614_v42  ;;  %779 = vmatmul.msk.f32.vlgmr.msra.gmra.mxu3 %vm627_vm2, %v620_v41 }
 0x22c   :  { %686 = vmatpush.msra.mxu2 %v618_v48 }
 0x22d   :  { %v612_v49 = vmul.f32 0.01, %v604_v46  ;;  %v613_v50 = vmul.f32 0.01, %v605_v47  ;;  %vm608_vm4 = vcmp.ge.f32.partialorder %v604_v46, 0.0  ;;  %vm609_vm5 = vcmp.ge.f32.partialorder %v605_v47, 0.0  ;;  %778 = vmatmul.msk.f32.vlgmr.msra.gmra.mxu2 %vm627_vm2, %v620_v41 }
 0x22f   :  { %v616_v51 = vsel %vm608_vm4, %v604_v46, %v612_v49  ;;  %v617_v53 = vsel %vm609_vm5, %v605_v47, %v613_v50 }
 0x230   :  { %646 = vmatpush.msra.mxu0 %v616_v51  ;;  %666 = vmatpush.msra.mxu1 %v617_v53 }
 0x231   :  { %777 = vmatmul.msk.f32.vlgmr.msra.gmra.mxu1 %vm627_vm2, %v620_v41  ;;  %776 = vmatmul.msk.f32.vlgmr.msra.gmra.mxu0 %vm627_vm2, %v620_v41 }
 0x2ae   :  { %v668_v55 = vpop.f32.mrf.mxu1  ;;  %v708_v61 = vpop.f32.mrf.mxu3 }
 0x2af   :  { %v669_v62 = vadd.f32 %v668_v55, %v625_v54  ;;  %v709_v56 = vadd.f32 %v708_v61, %v625_v54  ;;  %v648_v57 = vpop.f32.mrf.mxu0 }
 0x2b0   :  { %v649_v63 = vadd.f32 %v648_v57, %v625_v54  ;;  %v688_v0 = vpop.f32.mrf.mxu2 }
 0x2b1   :  { %vm712_vm6 = vcmp.ge.f32.partialorder %v669_v62, 0.0  ;;  %v716_v1 = vmul.f32 0.01, %v669_v62  ;;  %vm714_vm7 = vcmp.ge.f32.partialorder %v709_v56, 0.0  ;;  %v718_v3 = vmul.f32 0.01, %v709_v56 }
 0x2b2   :  { %vm711_vm8 = vcmp.ge.f32.partialorder %v649_v63, 0.0  ;;  %v715_v24 = vmul.f32 0.01, %v649_v63  ;;  %v689_v2 = vadd.f32 %v688_v0, %v625_v54 }
 0x2b3   :  { %v720_v11 = vsel %vm712_vm6, %v669_v62, %v716_v1  ;;  %v722_v4 = vsel %vm714_vm7, %v709_v56, %v718_v3 }
 0x2b4   :  { %v735_v52 = vadd.f32 %v727_v25, %v720_v11  ;;  %v737_v6 = vadd.f32 %v729_v58, %v722_v4  ;;  %v719_v7 = vsel %vm711_vm8, %v649_v63, %v715_v24  ;;  %vm713_vm9 = vcmp.ge.f32.partialorder %v689_v2, 0.0 }
 0x2b5   :  { %v717_v8 = vmul.f32 0.01, %v689_v2  ;;  %v734_v15 = vadd.f32 %v726_v10, %v719_v7 }
 0x2b6   :  { %v742_v13 = vrot.slane %v735_v52, 4  ;;  %v743_v14 = vrot.slane %v737_v6, 4 }
 0x2b7   :  { %v721_v16 = vsel %vm713_vm9, %v689_v2, %v717_v8 }
 0x2b8   :  { %v744_v59 = vsel %vm60_vm0, %v734_v15, %v742_v13  ;;  %v736_v60 = vadd.f32 %v728_v12, %v721_v16 }
 0x2b9   :  { %748 = vst [vmem:[%s1286_s11] sm:$0xff] %v744_v59 }
 0x2ba   :  { %v745_v17 = vsel %vm60_vm0, %v736_v60, %v743_v14 }
 0x2bb   :  { %749 = vst [vmem:[%s1286_s11 + $0x8] sm:$0xff] %v745_v17 }

</bundles_post_ra>
